<compile_context>
chip_gen: v7x
topology: tpu7x:2x2x1
jax: 0.10.0
libtpu: 0.0.40
codegen_flags: <defaults>
</compile_context>

<pallas_src>
import jax
import jax.numpy as jnp
from jax.experimental import pallas as pl
from jax.experimental.pallas import tpu as pltpu

OUT_FEATURES = 88
OUT_P = 128 * pl.cdiv(OUT_FEATURES, 128)  # lane-dense padded output width (=128)


def _linear_kernel(x_ref, w_ref, b_ref, o_ref):
    # MXU matmul with f32 accumulation; bias add rides free VALU slots.
    acc = jnp.dot(x_ref[...], w_ref[...], preferred_element_type=jnp.float32)
    o_ref[...] = (acc + b_ref[...]).astype(o_ref.dtype)


def _vmem_capacity_bytes():
    """Best-effort per-core VMEM capacity; conservative fallback if unknown."""
    try:
        return int(pltpu.get_tpu_info().vmem_capacity_bytes)
    except Exception:
        return 64 << 20  # assume v7x-sized per-core VMEM


def _generation_tuning():
    cap = _vmem_capacity_bytes()
    if cap > (64 << 20):
        # v5e / v6e: 128 MiB physical VMEM -> bigger tiles, fewer grid steps.
        return {"budget_per_buffer": 24 << 20, "tm_cap": 4096, "vmem_clamp": 100 << 20}
    # v7x: 64 MiB per TensorCore -> leave headroom for Mosaic internal scratch.
    return {"budget_per_buffer": 10 << 20, "tm_cap": 1024, "vmem_clamp": 52 << 20}


def _choose_tm(M, H, itemsize, budget_per_buffer, tm_cap):
    """Row tile: as large as the per-buffer VMEM budget allows, rounded to the
    dtype-correct sublane multiple; when tiled, keep an even tile count so the
    'parallel' grid axis splits evenly across v7x's two TensorCores."""
    sub = max(8, 32 // itemsize)  # 8 for f32, 16 for bf16, 32 for int8/fp8
    tm_max = budget_per_buffer // max(1, H * itemsize)
    tm_max = max(sub, min(int(tm_max), tm_cap))
    tm_max = (tm_max // sub) * sub
    if tm_max >= M:
        return M  # single full-extent block (exempt from (8,128) divisibility)
    n = pl.cdiv(M, tm_max)
    n = 2 * pl.cdiv(n, 2)                      # even number of row tiles
    tm = sub * pl.cdiv(pl.cdiv(M, n), sub)     # ceil to sublane multiple
    return min(max(tm, sub), tm_max)


def prepare_classifier_params(w, b):
    """ONE-TIME prep: zero-pad (H, 88) weight / (88,) bias to lane-dense width.

    Call at init / weight-load time, not per forward (saves a per-call pad op
    and an extra HBM pass).  Padded columns are exactly zero, so results match
    the unpadded Linear bit-for-bit after slicing.
    """
    H, out = w.shape
    out_p = 128 * pl.cdiv(out, 128)
    if out_p != out:
        w_p = jnp.zeros((H, out_p), dtype=w.dtype).at[:, :out].set(w)
        b_p = jnp.zeros((out_p,), dtype=b.dtype).at[:out].set(b)
    else:
        w_p, b_p = w, b
    return w_p, b_p.reshape(1, out_p), out


def classifier_forward(x, w_p, b_p, out_features=OUT_FEATURES, return_padded=False):
    """Pallas equivalent of nn.Linear(hidden_feature, 88).

    Args:
      x:   (..., H) activations.
      w_p: (H, OUT_P) pre-padded weight (from prepare_classifier_params;
           transposed relative to PyTorch's (out, in) layout).
      b_p: (1, OUT_P) pre-padded bias.
      out_features: logical output width (88).
      return_padded: if True, return the lane-dense (..., OUT_P) slab and let
        the consumer slice (avoids any standalone slice pass).
    Returns:
      (..., 88) output (or (..., OUT_P) if return_padded), dtype of x.
    """
    orig_shape = x.shape
    H = orig_shape[-1]
    out_p = w_p.shape[1]

    x2d = x.reshape(-1, H)
    M = x2d.shape[0]
    itemsize = jnp.dtype(x.dtype).itemsize
    w_itemsize = jnp.dtype(w_p.dtype).itemsize

    tune = _generation_tuning()
    tm = _choose_tm(M, H, itemsize, tune["budget_per_buffer"], tune["tm_cap"])
    grid = (pl.cdiv(M, tm),)

    # Honest VMEM accounting: Pallas double-buffers *every* input by default,
    # including the grid-invariant weight/bias, so charge those 2x too.
    vmem_bytes = (
        2 * tm * H * itemsize                         # double-buffered x tiles
        + 2 * tm * out_p * itemsize                   # double-buffered out tiles
        + 2 * (H * out_p + out_p) * w_itemsize        # weight + bias (2x)
        + (2 << 20)                                   # headroom
    )
    vmem_bytes = int(min(max(vmem_bytes, 16 << 20), tune["vmem_clamp"]))

    out = pl.pallas_call(
        _linear_kernel,
        out_shape=jax.ShapeDtypeStruct((M, out_p), x.dtype),
        grid=grid,
        in_specs=[
            pl.BlockSpec((tm, H), lambda i: (i, 0)),      # streamed row tiles
            pl.BlockSpec((H, out_p), lambda i: (0, 0)),   # VMEM-resident weight
            pl.BlockSpec((1, out_p), lambda i: (0, 0)),   # VMEM-resident bias
        ],
        out_specs=pl.BlockSpec((tm, out_p), lambda i: (i, 0)),
        compiler_params=pltpu.CompilerParams(
            dimension_semantics=("parallel",),  # v7x shards row tiles across TCs
            vmem_limit_bytes=vmem_bytes,
        ),
        cost_estimate=pl.CostEstimate(
            flops=2 * M * H * out_p,
            transcendentals=0,
            bytes_accessed=(M * H * itemsize
                            + H * out_p * w_itemsize
                            + M * out_p * itemsize),
        ),
    )(x2d, w_p, b_p)

    if return_padded:
        return out.reshape(*orig_shape[:-1], out_p)
    # 88-column view: under jit this slice fuses with downstream consumers
    # instead of costing a separate HBM pass.
    return out[:, :out_features].reshape(*orig_shape[:-1], out_features)


if __name__ == "__main__":
    batch, seq, hidden = 2, 8, 32
    kx, kw, kb = jax.random.split(jax.random.PRNGKey(0), 3)
    x = jax.random.normal(kx, (batch, seq, hidden), dtype=jnp.float32)

    # Deterministic synthetic parameters matching nn.Linear(hidden, 88) shapes
    # (PyTorch weight is (out, in); we keep the transposed (in, out) layout).
    bound = 1.0 / (hidden ** 0.5)
    w = jax.random.uniform(kw, (hidden, OUT_FEATURES), jnp.float32,
                           minval=-bound, maxval=bound)
    b = jax.random.uniform(kb, (OUT_FEATURES,), jnp.float32,
                           minval=-bound, maxval=bound)

    # One-time parameter prep: lane-dense padding happens here, not per call.
    w_p, b_p, out_features = prepare_classifier_params(w, b)

    fwd = jax.jit(lambda xx, ww, bb: classifier_forward(xx, ww, bb, out_features))
    y = jax.block_until_ready(fwd(x, w_p, b_p))

    # Sanity check against plain-JAX reference of the same Linear.
    y_ref = x @ w + b
    assert y.shape == (batch, seq, OUT_FEATURES), y.shape
    assert jnp.allclose(y, y_ref, atol=1e-5, rtol=1e-5)

    print("KERNEL_OK")
</pallas_src>

<mosaic_0001>
module attributes {stable_mosaic.version = 11 : i64} {
  func.func @_linear_kernel(%arg0: i32, %arg1: memref<16x32xf32, #tpu.memory_space<vmem>>, %arg2: memref<32x128xf32, #tpu.memory_space<vmem>>, %arg3: memref<1x128xf32, #tpu.memory_space<vmem>>, %arg4: memref<16x128xf32, #tpu.memory_space<vmem>>) attributes {dimension_semantics = [#tpu.dimension_semantics<parallel>], iteration_bounds = array<i64: 1>, scalar_prefetch = 0 : i64, scratch_operands = 0 : i64, tpu.core_type = #tpu.core_type<tc>, window_params = [{transform_indices = @transform_0, window_bounds = array<i64: 16, 32>}, {pipeline_mode = #tpu.pipeline_mode<synchronous>, transform_indices = @transform_1, window_bounds = array<i64: 32, 128>}, {pipeline_mode = #tpu.pipeline_mode<synchronous>, transform_indices = @transform_2, window_bounds = array<i64: 1, 128>}, {transform_indices = @transform_3, window_bounds = array<i64: 16, 128>}]} {
    %c0 = arith.constant 0 : index
    %c0_0 = arith.constant 0 : index
    %0 = vector.load %arg1[%c0, %c0_0] : memref<16x32xf32, #tpu.memory_space<vmem>>, vector<16x32xf32>
    %c0_1 = arith.constant 0 : index
    %c0_2 = arith.constant 0 : index
    %1 = vector.load %arg2[%c0_1, %c0_2] : memref<32x128xf32, #tpu.memory_space<vmem>>, vector<32x128xf32>
    %cst = arith.constant dense<0.000000e+00> : vector<16x128xf32>
    %2 = tpu.matmul %0, %1, %cst {dimension_numbers = #tpu.dot_dimension_numbers<[1], [0], [0], [1], [0, 0, 1, 1], [], []>} : vector<16x32xf32>, vector<32x128xf32>, vector<16x128xf32> -> vector<16x128xf32>
    %c0_3 = arith.constant 0 : index
    %c0_4 = arith.constant 0 : index
    %3 = vector.load %arg3[%c0_3, %c0_4] : memref<1x128xf32, #tpu.memory_space<vmem>>, vector<1x128xf32>
    %4 = vector.broadcast %3 : vector<1x128xf32> to vector<16x128xf32>
    %5 = arith.addf %2, %4 : vector<16x128xf32>
    %c0_5 = arith.constant 0 : index
    %c0_6 = arith.constant 0 : index
    %6 = vector.load %arg4[%c0_5, %c0_6] : memref<16x128xf32, #tpu.memory_space<vmem>>, vector<16x128xf32>
    tpu.vector_store %arg4[%c0_5, %c0_6], %5 {strides = array<i32>} : memref<16x128xf32, #tpu.memory_space<vmem>>, vector<16x128xf32>,
    return
  }
  func.func @transform_0(%arg0: i32) -> (i32, i32) {
    %c0_i32 = arith.constant 0 : i32
    %c0_i32_0 = arith.constant 0 : i32
    return %arg0, %c0_i32 : i32, i32
  }
  func.func @transform_1(%arg0: i32) -> (i32, i32) {
    %c0_i32 = arith.constant 0 : i32
    %c0_i32_0 = arith.constant 0 : i32
    %c0_i32_1 = arith.constant 0 : i32
    return %c0_i32, %c0_i32_0 : i32, i32
  }
  func.func @transform_2(%arg0: i32) -> (i32, i32) {
    %c0_i32 = arith.constant 0 : i32
    %c0_i32_0 = arith.constant 0 : i32
    %c0_i32_1 = arith.constant 0 : i32
    return %c0_i32, %c0_i32_0 : i32, i32
  }
  func.func @transform_3(%arg0: i32) -> (i32, i32) {
    %c0_i32 = arith.constant 0 : i32
    %c0_i32_0 = arith.constant 0 : i32
    return %arg0, %c0_i32 : i32, i32
  }
}

</mosaic_0001>

<bundles_post_ra>
// kernel: _lambda_.1
= control target key start
LH: loop header
LB: loop body
LE: loop exit
PB: predicated region body
PF: predicated region fallthrough
CT: control target
= control target key end

     0   :  { %8 = vsyncpa [#allocation3], 0  ;;  %s282_s0 = inlined_call_operand.hbm [shape: f32[16,32], index: 0, kind: input, shape index: {}]   ;;  %s283_s1 = inlined_call_operand.hbm [shape: f32[32,128], index: 1, kind: input, shape index: {}]   ;;  %s284_s2 = inlined_call_operand.vmem [shape: f32[1,128], index: 2, kind: input, shape index: {}]   ;;  %s285_s3 = inlined_call_operand.vmem [shape: f32[16,128], index: 3, kind: output, shape index: {}]  }
   0x1   :  { %9 = vsyncpa [#allocation5], 0  ;;  %s225_s12 = smov [#allocation2]   ;;  %s177_s16 = scalar_lea.hbm %s282_s0, 256 }
   0x2   :  { %s15_s13 = sshll.u32 %s225_s12, 4  ;;  %p178_p0 = scmp.ne.s32.totalorder %s282_s0, %s177_s16  ;;  %s16_s13 = int_to_ptr.vmem [resolvable:$true] %s15_s13 }
   0x3   :  { %p181_p1 = scmp.lt.u32.totalorder %s177_s16, %s282_s0 }
   0x5   :  { %p183_p2 = pnand %p181_p1, %p178_p0 }
   0x7   :  { %186 = shalt.err (!%p183_p2)
}
   0x8   :  { %s187_s21 = scalar_lea.vmem %s16_s13, 256  ;;  %p192_p4 = scmp.lt.s32.totalorder %s16_s13, %s16_s13 }
   0x9   :  { %p188_p3 = scmp.ne.s32.totalorder %s16_s13, %s187_s21  ;;  %p193_p5 = scmp.lt.s32.totalorder %s187_s21, %s187_s21 }
   0xb   :  { %p194_p6 = por %p193_p5, %p192_p4 }
   0xd   :  { %p195_p7 = pnand %p194_p6, %p188_p3 }
   0xf   :  { %198 = shalt.err (!%p195_p7)
}
  0x10   :  { %s226_s22 = smov 128   ;;  %s227_s23 = smov 8  }
  0x11   :  { %21 = dma.hbm_to_vmem [thread:$0]  %s282_s0, 256, %s16_s13, [#allocation3], %s226_s22, %s226_s22, %s227_s23  }
  0x12   :  { %s228_s26 = smov [#allocation4]   ;;  %s199_s30 = scalar_lea.hbm %s283_s1, 512 }
  0x13   :  { %s27_s27 = sshll.u32 %s228_s26, 4  ;;  %p200_p8 = scmp.ne.s32.totalorder %s283_s1, %s199_s30  ;;  %s28_s27 = int_to_ptr.vmem [resolvable:$true] %s27_s27 }
  0x14   :  { %p203_p9 = scmp.lt.u32.totalorder %s199_s30, %s283_s1 }
  0x16   :  { %p205_p10 = pnand %p203_p9, %p200_p8 }
  0x18   :  { %208 = shalt.err (!%p205_p10)
}
  0x19   :  { %s209_s8 = scalar_lea.vmem %s28_s27, 512  ;;  %p214_p12 = scmp.lt.s32.totalorder %s28_s27, %s28_s27 }
  0x1a   :  { %p210_p11 = scmp.ne.s32.totalorder %s28_s27, %s209_s8  ;;  %p215_p13 = scmp.lt.s32.totalorder %s209_s8, %s209_s8 }
  0x1c   :  { %p216_p0 = por %p215_p13, %p214_p12 }
  0x1e   :  { %p217_p1 = pnand %p216_p0, %p210_p11 }
  0x20   :  { %220 = shalt.err (!%p217_p1)
}
  0x21   :  { %33 = dma.hbm_to_vmem [thread:$0]  %s283_s1, 512, %s28_s27, [#allocation5], %s226_s22, %s226_s22, %s227_s23  }
  0x22   :  { %221 = dma.done.wait [#allocation3], 256  }
  0x23   :  { %222 = vsyncadd [#allocation3], 4294967040 }
  0x24   :  { %223 = dma.done.wait [#allocation5], 512  }
  0x25   :  { %224 = vsyncadd [#allocation5], 4294966784  ;;  %vm55_vm0 = vcmask 261120   ;;  %v44_v0 = vld [vmem:[#allocation4] sm:$0xff]  ;;  %v45_v1 = vld [vmem:[#allocation4 + $0x8] sm:$0xff] }
  0x26   :  { %v46_v2 = vld [vmem:[#allocation4 + $0x10] sm:$0xff]  ;;  %v165_v3 = vpack.c.bf16 %v45_v1, %v44_v0  ;;  %v47_v4 = vld [vmem:[#allocation4 + $0x18] sm:$0xff] }
  0x27   :  { %v42_v5 = vld [vmem:[#allocation2] sm:$0xff]  ;;  %v169_v6 = vpack.c.bf16 %v47_v4, %v46_v2  ;;  %v43_v7 = vld [vmem:[#allocation2 + $0x8] sm:$0xff] }
  0x28   :  { %162 = vmatprep.mubr.msk.f32.mxu0 %vm55_vm0, %v42_v5  ;;  %166 = vmatprep.subr.bf16.mxu0 %v165_v3  ;;  %v145_v8 = vld [vmem:[%s284_s2] ss:$0 sm:$0xff] }
  0x29   :  { %168 = vmatpush3.bf16.msra.mxu0 %v165_v3 }
  0x2a   :  { %170 = vmatprep.subr.bf16.mxu0 %v169_v6 }
  0x2d   :  { %172 = vmatpush3.bf16.msra.mxu0 %v169_v6 }
  0x30   :  { %163 = vmatmul.mubr.msk.f32.vlgmr.msra.gmra.mrb[0].mxu0 %vm55_vm0, %v43_v7 }
 0x103   :  { %v164_v9 = vpop.f32.mrb[0].mxu0 }
 0x104   :  { %v134_v10 = vadd.f32 %v164_v9, %v145_v8  ;;  %v128_v11 = vpop.f32.mrb[1].mxu0 }
 0x105   :  { %v129_v12 = vadd.f32 %v145_v8, %v128_v11 }
 0x106   :  { %138 = vst [vmem:[%s285_s3 + $0x8] sm:$0xff] %v134_v10 }
 0x107   :  { %137 = vst [vmem:[%s285_s3] sm:$0xff] %v129_v12 }
 0x108   :  { %143 = vsyncpa [#allocation3], 1 }
 0x109   :  { %144 = vsyncpa [#allocation5], 1 }

</bundles_post_ra>
